<compile_context>
chip_gen: v7x
topology: tpu7x:2x2x1
jax: 0.10.0
libtpu: 0.0.40
codegen_flags: <defaults>
</compile_context>

<pallas_src>
import jax
import jax.numpy as jnp
from jax import lax
from jax.experimental import pallas as pl
from jax.experimental.pallas import tpu as pltpu


def _round_up(x, m):
    return ((x + m - 1) // m) * m


def _tpu_defaults():
    """(num_splits, vmem_limit_bytes, tile_budget_bytes) per TPU generation."""
    kind = ""
    try:
        kind = getattr(jax.devices()[0], "device_kind", "").lower()
    except Exception:
        pass
    if "v7" in kind:
        # v7x: 2 TensorCores/chip, only 64 MiB VMEM per TC -> conservative limit.
        return 2, 40 * 1024 * 1024, 32 * 1024 * 1024
    # v5e / v6e: 1 TensorCore, 128 MiB physical VMEM.
    return 1, 64 * 1024 * 1024, 48 * 1024 * 1024


def contrast_loss(anchor_fea, reassembly_fea, contrast_label, *,
                  tile_b=None, num_splits=None):
    """anchor_fea, reassembly_fea: [B, D]; contrast_label: [B] (any numeric dtype)."""
    B, D = anchor_fea.shape
    assert reassembly_fea.shape == (B, D)

    in_dtype = anchor_fea.dtype
    itemsize = jnp.dtype(in_dtype).itemsize
    # dtype-aware sublane multiple: 8 for f32, 16 for bf16, 32 for int8/fp8.
    sublane = max(8, 32 // itemsize)

    default_splits, vmem_limit, tile_budget = _tpu_defaults()
    if num_splits is None:
        num_splits = default_splits if B >= 2 * sublane else 1
    if tile_b is None:
        # VMEM per batch row: 2 inputs x 2 pipeline buffers in the input dtype
        # plus headroom for up to ~5 tile-sized f32 temporaries (f32 casts and
        # the a*r / a*a / r*r products if Mosaic does not fully fuse them).
        per_row = D * (4 * itemsize + 5 * 4) + 16
        tile_b = tile_budget // max(per_row, 1)
        tile_b = max(sublane,
                     min(8192, tile_b,
                         _round_up(pl.cdiv(B, num_splits), sublane)))
    tile_b = _round_up(max(tile_b, sublane), sublane)

    tiles_total = pl.cdiv(B, tile_b)                     # real tiles covering B
    tiles_per_split = pl.cdiv(tiles_total, num_splits)
    b_pad = num_splits * tiles_per_split * tile_b        # nominal padded rows

    # Per-row weight = label / B (folds the mean); zero-pad ONLY this tiny
    # vector to the nominal grid extent.  Feature matrices are NOT padded.
    weight = (contrast_label.astype(jnp.float32) / jnp.float32(B)).reshape(B, 1)
    if b_pad != B:
        weight = jnp.pad(weight, ((0, b_pad - B), (0, 0)))

    # Resident (fetched-once) weight unless its layout-padded VMEM footprint
    # (~b_pad * 512 B for a lane-sparse [b_pad, 1] f32 array) gets large.
    weight_resident = (b_pad * 512) <= (4 * 1024 * 1024)

    def feat_index_map(c, i):
        blk = c * tiles_per_split + i
        # Clamp so a fully-out-of-range grid step re-reads the last real tile
        # (its rows are masked out in-kernel), keeping every DMA in bounds.
        return (jnp.minimum(blk, tiles_total - 1), 0)

    if weight_resident:
        weight_spec = pl.BlockSpec((b_pad, 1), lambda c, i: (0, 0))
    else:
        weight_spec = pl.BlockSpec((tile_b, 1),
                                   lambda c, i: (c * tiles_per_split + i, 0))

    def kernel(anchor_ref, reasm_ref, weight_ref, out_ref):
        c = pl.program_id(0)
        i = pl.program_id(1)

        @pl.when(i == 0)
        def _():
            out_ref[...] = jnp.zeros_like(out_ref)

        step = c * tiles_per_split + i
        row_start = pl.multiple_of(step * tile_b, tile_b)

        # Cast to f32 before the products (matches the f32 reference path;
        # free under the HBM bound).
        a = anchor_ref[...].astype(jnp.float32)          # [tile_b, D]
        r = reasm_ref[...].astype(jnp.float32)           # [tile_b, D]
        if weight_resident:
            w = weight_ref[pl.ds(row_start, tile_b), :]  # [tile_b, 1]
        else:
            w = weight_ref[...]                          # [tile_b, 1]

        # Lane (dim=-1) reductions on the VPU/XLU.
        dot = jnp.sum(a * r, axis=-1, keepdims=True)     # [tile_b, 1]
        saa = jnp.sum(a * a, axis=-1, keepdims=True)
        srr = jnp.sum(r * r, axis=-1, keepdims=True)

        # cosine_similarity clamps each norm at eps=1e-8; sqrt is monotone so
        # clamp the squared norms at eps**2 and take rsqrt on the EUP.
        eps2 = jnp.float32(1e-16)
        cos = dot * lax.rsqrt(jnp.maximum(saa, eps2)) * lax.rsqrt(jnp.maximum(srr, eps2))

        # Mask the ragged tail / clamped tiles: out-of-range rows may hold
        # garbage (possibly NaN/Inf) and must not touch the accumulator.
        row_ids = row_start + lax.broadcasted_iota(jnp.int32, (tile_b, 1), 0)
        contrib = jnp.where(row_ids < B, -cos * w, jnp.float32(0.0))

        out_ref[...] = out_ref[...] + jnp.sum(contrib)

    cost = pl.CostEstimate(
        flops=6 * B * D + 5 * B,
        transcendentals=2 * B,
        bytes_accessed=2 * B * D * itemsize + b_pad * 4 + num_splits * 8 * 128 * 4,
    )

    out = pl.pallas_call(
        kernel,
        out_shape=jax.ShapeDtypeStruct((num_splits, 8, 128), jnp.float32),
        grid=(num_splits, tiles_per_split),
        in_specs=[
            pl.BlockSpec((tile_b, D), feat_index_map),
            pl.BlockSpec((tile_b, D), feat_index_map),
            weight_spec,
        ],
        out_specs=pl.BlockSpec((1, 8, 128), lambda c, i: (c, 0, 0)),
        compiler_params=pltpu.CompilerParams(
            dimension_semantics=("parallel", "arbitrary"),
            vmem_limit_bytes=vmem_limit,
        ),
        cost_estimate=cost,
    )(anchor_fea, reassembly_fea, weight)

    # Per-split partial sums live at [c, 0, 0]; combine outside the kernel.
    return jnp.sum(out[:, 0, 0])


def _reference(anchor_fea, reassembly_fea, contrast_label):
    a = anchor_fea.astype(jnp.float32)
    r = reassembly_fea.astype(jnp.float32)
    lbl = contrast_label.astype(jnp.float32)
    eps = 1e-8
    dot = jnp.sum(a * r, axis=-1)
    na = jnp.maximum(jnp.linalg.norm(a, axis=-1), eps)
    nr = jnp.maximum(jnp.linalg.norm(r, axis=-1), eps)
    return jnp.mean(-(dot / (na * nr)) * lbl)


if __name__ == "__main__":
    key = jax.random.PRNGKey(0)
    ks = jax.random.split(key, 9)

    # Case 1: tiny single-tile problem (B=8, D=32).
    B1, D1 = 8, 32
    a1 = jax.random.normal(ks[0], (B1, D1), dtype=jnp.float32)
    r1 = jax.random.normal(ks[1], (B1, D1), dtype=jnp.float32)
    l1 = jax.random.bernoulli(ks[2], p=0.5, shape=(B1,)).astype(jnp.float32)
    out1 = contrast_loss(a1, r1, l1)
    jax.block_until_ready(out1)
    ref1 = _reference(a1, r1, l1)
    assert jnp.allclose(out1, ref1, atol=1e-5, rtol=1e-4), (out1, ref1)

    # Case 2: ragged batch, forced 2-way split + small tiles to exercise the
    # clamped fully-out-of-range block path and the in-kernel row masking.
    B2, D2 = 20, 256
    a2 = jax.random.normal(ks[3], (B2, D2), dtype=jnp.float32)
    r2 = jax.random.normal(ks[4], (B2, D2), dtype=jnp.float32)
    l2 = jax.random.bernoulli(ks[5], p=0.5, shape=(B2,)).astype(jnp.float32)
    out2 = contrast_loss(a2, r2, l2, tile_b=8, num_splits=2)
    jax.block_until_ready(out2)
    ref2 = _reference(a2, r2, l2)
    assert jnp.allclose(out2, ref2, atol=1e-5, rtol=1e-4), (out2, ref2)

    # Case 3: bf16 inputs (exercises dtype-aware sublane rounding + f32 cast)
    # with a ragged tail masked in-kernel.
    B3, D3 = 24, 128
    a3 = jax.random.normal(ks[6], (B3, D3), dtype=jnp.float32).astype(jnp.bfloat16)
    r3 = jax.random.normal(ks[7], (B3, D3), dtype=jnp.float32).astype(jnp.bfloat16)
    l3 = jax.random.bernoulli(ks[8], p=0.5, shape=(B3,)).astype(jnp.float32)
    out3 = contrast_loss(a3, r3, l3)
    jax.block_until_ready(out3)
    ref3 = _reference(a3, r3, l3)
    assert jnp.allclose(out3, ref3, atol=1e-4, rtol=1e-3), (out3, ref3)

    print("KERNEL_OK")
</pallas_src>

<mosaic_0001>
module attributes {stable_mosaic.version = 11 : i64} {
  func.func @kernel(%arg0: i32, %arg1: i32, %arg2: memref<8x32xf32, #tpu.memory_space<vmem>>, %arg3: memref<8x32xf32, #tpu.memory_space<vmem>>, %arg4: memref<8x1xf32, #tpu.memory_space<vmem>>, %arg5: memref<1x8x128xf32, #tpu.memory_space<vmem>>) attributes {dimension_semantics = [#tpu.dimension_semantics<parallel>, #tpu.dimension_semantics<arbitrary>], iteration_bounds = array<i64: 1, 1>, scalar_prefetch = 0 : i64, scratch_operands = 0 : i64, tpu.core_type = #tpu.core_type<tc>, window_params = [{transform_indices = @transform_0, window_bounds = array<i64: 8, 32>}, {transform_indices = @transform_1, window_bounds = array<i64: 8, 32>}, {pipeline_mode = #tpu.pipeline_mode<synchronous>, transform_indices = @transform_2, window_bounds = array<i64: 8, 1>}, {transform_indices = @transform_3, window_bounds = array<i64: 1, 8, 128>}]} {
    %c0_i32 = arith.constant 0 : i32
    %0 = arith.cmpi eq, %arg1, %c0_i32 : i32
    %1 = arith.extui %0 : i1 to i32
    %c0_i32_0 = arith.constant 0 : i32
    %2 = arith.cmpi ne, %1, %c0_i32_0 : i32
    scf.if %2 {
      %cst_19 = arith.constant 0.000000e+00 : f32
      %46 = vector.broadcast %cst_19 : f32 to vector<1x8x128xf32>
      %c0_20 = arith.constant 0 : index
      %c0_21 = arith.constant 0 : index
      %c0_22 = arith.constant 0 : index
      %47 = vector.load %arg5[%c0_20, %c0_21, %c0_22] : memref<1x8x128xf32, #tpu.memory_space<vmem>>, vector<1x8x128xf32>
      tpu.vector_store %arg5[%c0_20, %c0_21, %c0_22], %46 {strides = array<i32>} : memref<1x8x128xf32, #tpu.memory_space<vmem>>, vector<1x8x128xf32>,
    } else {
    }
    %c1_i32 = arith.constant 1 : i32
    %3 = arith.muli %arg0, %c1_i32 : i32
    %4 = arith.addi %3, %arg1 : i32
    %c8_i32 = arith.constant 8 : i32
    %5 = arith.muli %4, %c8_i32 : i32
    %6 = tpu.assume_multiple %5, 8 : i32
    %c0 = arith.constant 0 : index
    %c0_1 = arith.constant 0 : index
    %7 = vector.load %arg2[%c0, %c0_1] : memref<8x32xf32, #tpu.memory_space<vmem>>, vector<8x32xf32>
    %c0_2 = arith.constant 0 : index
    %c0_3 = arith.constant 0 : index
    %8 = vector.load %arg3[%c0_2, %c0_3] : memref<8x32xf32, #tpu.memory_space<vmem>>, vector<8x32xf32>
    %9 = arith.index_cast %6 : i32 to index
    %c0_4 = arith.constant 0 : index
    %10 = vector.load %arg4[%9, %c0_4] : memref<8x1xf32, #tpu.memory_space<vmem>>, vector<8x1xf32>
    %11 = arith.mulf %7, %8 : vector<8x32xf32>
    %cst = arith.constant dense<0.000000e+00> : vector<8xf32>
    %12 = vector.multi_reduction <add>, %11, %cst [1] : vector<8x32xf32> to vector<8xf32>
    %13 = vector.shape_cast %12 : vector<8xf32> to vector<8x1xf32>
    %14 = arith.mulf %7, %7 : vector<8x32xf32>
    %cst_5 = arith.constant dense<0.000000e+00> : vector<8xf32>
    %15 = vector.multi_reduction <add>, %14, %cst_5 [1] : vector<8x32xf32> to vector<8xf32>
    %16 = vector.shape_cast %15 : vector<8xf32> to vector<8x1xf32>
    %17 = arith.mulf %8, %8 : vector<8x32xf32>
    %cst_6 = arith.constant dense<0.000000e+00> : vector<8xf32>
    %18 = vector.multi_reduction <add>, %17, %cst_6 [1] : vector<8x32xf32> to vector<8xf32>
    %19 = vector.shape_cast %18 : vector<8xf32> to vector<8x1xf32>
    %cst_7 = arith.constant 1.000000e-16 : f32
    %20 = vector.broadcast %cst_7 : f32 to vector<8x1xf32>
    %21 = arith.maximumf %16, %20 : vector<8x1xf32>
    %22 = math.rsqrt %21 : vector<8x1xf32>
    %23 = arith.mulf %13, %22 : vector<8x1xf32>
    %cst_8 = arith.constant 1.000000e-16 : f32
    %24 = vector.broadcast %cst_8 : f32 to vector<8x1xf32>
    %25 = arith.maximumf %19, %24 : vector<8x1xf32>
    %26 = math.rsqrt %25 : vector<8x1xf32>
    %27 = arith.mulf %23, %26 : vector<8x1xf32>
    %28 = tpu.iota {dimensions = array<i32: 0>} : vector<8x1xi32>
    %29 = vector.broadcast %6 : i32 to vector<8x1xi32>
    %30 = arith.addi %29, %28 : vector<8x1xi32>
    %c8_i32_9 = arith.constant 8 : i32
    %31 = vector.broadcast %c8_i32_9 : i32 to vector<8x1xi32>
    %32 = arith.cmpi slt, %30, %31 : vector<8x1xi32>
    %cst_10 = arith.constant 0.000000e+00 : f32
    %33 = vector.broadcast %cst_10 : f32 to vector<8x1xf32>
    %34 = arith.subf %33, %27 : vector<8x1xf32>
    %35 = arith.mulf %34, %10 : vector<8x1xf32>
    %cst_11 = arith.constant 0.000000e+00 : f32
    %36 = vector.broadcast %cst_11 : f32 to vector<8x1xf32>
    %37 = arith.select %32, %35, %36 : vector<8x1xi1>, vector<8x1xf32>
    %c0_12 = arith.constant 0 : index
    %c0_13 = arith.constant 0 : index
    %c0_14 = arith.constant 0 : index
    %38 = vector.load %arg5[%c0_12, %c0_13, %c0_14] : memref<1x8x128xf32, #tpu.memory_space<vmem>>, vector<1x8x128xf32>
    %39 = vector.shape_cast %37 : vector<8x1xf32> to vector<1x8x1xf32>
    %cst_15 = arith.constant dense<0.000000e+00> : vector<1xf32>
    %40 = vector.multi_reduction <add>, %39, %cst_15 [1, 2] : vector<1x8x1xf32> to vector<1xf32>
    %41 = vector.shape_cast %40 : vector<1xf32> to vector<1x1x1xf32>
    %42 = vector.extract %41[0, 0, 0] : f32 from vector<1x1x1xf32>
    %43 = vector.broadcast %42 : f32 to vector<1x8x128xf32>
    %44 = arith.addf %38, %43 : vector<1x8x128xf32>
    %c0_16 = arith.constant 0 : index
    %c0_17 = arith.constant 0 : index
    %c0_18 = arith.constant 0 : index
    %45 = vector.load %arg5[%c0_16, %c0_17, %c0_18] : memref<1x8x128xf32, #tpu.memory_space<vmem>>, vector<1x8x128xf32>
    tpu.vector_store %arg5[%c0_16, %c0_17, %c0_18], %44 {strides = array<i32>} : memref<1x8x128xf32, #tpu.memory_space<vmem>>, vector<1x8x128xf32>,
    return
  }
  func.func @transform_0(%arg0: i32, %arg1: i32) -> (i32, i32) {
    %c1_i32 = arith.constant 1 : i32
    %0 = arith.muli %arg0, %c1_i32 : i32
    %1 = arith.addi %0, %arg1 : i32
    %c0_i32 = arith.constant 0 : i32
    %2 = arith.minsi %1, %c0_i32 : i32
    %c0_i32_0 = arith.constant 0 : i32
    %c0_i32_1 = arith.constant 0 : i32
    return %2, %c0_i32_0 : i32, i32
  }
  func.func @transform_1(%arg0: i32, %arg1: i32) -> (i32, i32) {
    %c1_i32 = arith.constant 1 : i32
    %0 = arith.muli %arg0, %c1_i32 : i32
    %1 = arith.addi %0, %arg1 : i32
    %c0_i32 = arith.constant 0 : i32
    %2 = arith.minsi %1, %c0_i32 : i32
    %c0_i32_0 = arith.constant 0 : i32
    %c0_i32_1 = arith.constant 0 : i32
    return %2, %c0_i32_0 : i32, i32
  }
  func.func @transform_2(%arg0: i32, %arg1: i32) -> (i32, i32) {
    %c0_i32 = arith.constant 0 : i32
    %c0_i32_0 = arith.constant 0 : i32
    %c0_i32_1 = arith.constant 0 : i32
    return %c0_i32, %c0_i32_0 : i32, i32
  }
  func.func @transform_3(%arg0: i32, %arg1: i32) -> (i32, i32, i32) {
    %c0_i32 = arith.constant 0 : i32
    %c0_i32_0 = arith.constant 0 : i32
    %c0_i32_1 = arith.constant 0 : i32
    return %arg0, %c0_i32, %c0_i32_0 : i32, i32, i32
  }
}

</mosaic_0001>

<bundles_post_ra>
// kernel: tpu_custom_call.1
= control target key start
LH: loop header
LB: loop body
LE: loop exit
PB: predicated region body
PF: predicated region fallthrough
CT: control target
= control target key end

     0   :  { %8 = vsyncpa [#allocation3], 0  ;;  %s316_s0 = inlined_call_operand.hbm [shape: f32[8,32], index: 0, kind: input, shape index: {}]   ;;  %s317_s1 = inlined_call_operand.hbm [shape: f32[8,32], index: 1, kind: input, shape index: {}]   ;;  %s318_s2 = inlined_call_operand.hbm [shape: f32[8,1], index: 2, kind: input, shape index: {}]   ;;  %s319_s3 = inlined_call_operand.hbm [shape: f32[1,8,128], index: 3, kind: output, shape index: {}]  }
   0x1   :  { %9 = vsyncpa [#allocation6], 0 }
   0x2   :  { %10 = vsyncpa [#allocation4], 0  ;;  %s244_s12 = smov [#allocation5]   ;;  %s245_s14 = smov [#allocation2]  }
   0x3   :  { %s37_s13 = sshll.u32 %s244_s12, 4  ;;  %s22_s15 = sshll.u32 %s245_s14, 4  ;;  %s38_s13 = int_to_ptr.vmem [resolvable:$true] %s37_s13  ;;  %s23_s15 = int_to_ptr.vmem [resolvable:$true] %s22_s15 }
   0x4   :  { %s150_s18 = scalar_lea.hbm %s317_s1, 128 }
   0x5   :  { %p151_p0 = scmp.ne.s32.totalorder %s317_s1, %s150_s18  ;;  %p154_p1 = scmp.lt.u32.totalorder %s150_s18, %s317_s1 }
   0x7   :  { %p156_p2 = pnand %p154_p1, %p151_p0 }
   0x9   :  { %159 = shalt.err (!%p156_p2)
}
   0xa   :  { %s160_s23 = scalar_lea.vmem %s38_s13, 128  ;;  %p165_p4 = scmp.lt.s32.totalorder %s38_s13, %s38_s13 }
   0xb   :  { %p161_p3 = scmp.ne.s32.totalorder %s38_s13, %s160_s23  ;;  %p166_p5 = scmp.lt.s32.totalorder %s160_s23, %s160_s23 }
   0xd   :  { %p167_p6 = por %p166_p5, %p165_p4 }
   0xf   :  { %p168_p7 = pnand %p167_p6, %p161_p3 }
  0x11   :  { %171 = shalt.err (!%p168_p7)
}
  0x12   :  { %40 = dma.hbm_to_vmem [thread:$0]  %s317_s1, 128, %s38_s13, [#allocation6]  }
  0x13   :  { %s172_s28 = scalar_lea.hbm %s316_s0, 128 }
  0x14   :  { %p173_p8 = scmp.ne.s32.totalorder %s316_s0, %s172_s28  ;;  %p176_p9 = scmp.lt.u32.totalorder %s172_s28, %s316_s0 }
  0x16   :  { %p178_p10 = pnand %p176_p9, %p173_p8 }
  0x18   :  { %181 = shalt.err (!%p178_p10)
}
  0x19   :  { %s182_s6 = scalar_lea.vmem %s23_s15, 128  ;;  %p187_p12 = scmp.lt.s32.totalorder %s23_s15, %s23_s15 }
  0x1a   :  { %p183_p11 = scmp.ne.s32.totalorder %s23_s15, %s182_s6  ;;  %p188_p13 = scmp.lt.s32.totalorder %s182_s6, %s182_s6 }
  0x1c   :  { %p189_p0 = por %p188_p13, %p187_p12 }
  0x1e   :  { %p190_p1 = pnand %p189_p0, %p183_p11 }
  0x20   :  { %193 = shalt.err (!%p190_p1)
}
  0x21   :  { %25 = dma.hbm_to_vmem [thread:$0]  %s316_s0, 128, %s23_s15, [#allocation3]  }
  0x22   :  { %s246_s8 = smov [#allocation7]   ;;  %s194_s12 = scalar_lea.hbm %s318_s2, 128 }
  0x23   :  { %s47_s9 = sshll.u32 %s246_s8, 4  ;;  %p195_p2 = scmp.ne.s32.totalorder %s318_s2, %s194_s12  ;;  %s48_s9 = int_to_ptr.vmem [resolvable:$true] %s47_s9 }
  0x24   :  { %p198_p3 = scmp.lt.u32.totalorder %s194_s12, %s318_s2 }
  0x26   :  { %p200_p4 = pnand %p198_p3, %p195_p2 }
  0x28   :  { %203 = shalt.err (!%p200_p4)
}
  0x29   :  { %s204_s18 = scalar_lea.vmem %s48_s9, 128  ;;  %p209_p6 = scmp.lt.s32.totalorder %s48_s9, %s48_s9 }
  0x2a   :  { %p205_p5 = scmp.ne.s32.totalorder %s48_s9, %s204_s18  ;;  %p210_p7 = scmp.lt.s32.totalorder %s204_s18, %s204_s18 }
  0x2c   :  { %p211_p8 = por %p210_p7, %p209_p6 }
  0x2e   :  { %p212_p9 = pnand %p211_p8, %p205_p5 }
  0x30   :  { %215 = shalt.err (!%p212_p9)
}
  0x31   :  { %50 = dma.hbm_to_vmem [thread:$0]  %s318_s2, 128, %s48_s9, [#allocation6]  }
  0x32   :  { %238 = dma.done.wait [#allocation3], 128  }
  0x33   :  { %239 = vsyncadd [#allocation3], 4294967168 }
  0x34   :  { %240 = dma.done.wait [#allocation6], 256  }
  0x35   :  { %241 = vsyncadd [#allocation6], 4294967040  ;;  %v73_v0 = vld [vmem:[#allocation2] sm:$0xff]  ;;  %vm78_vm0 = vcmask 261120   ;;  %v74_v1 = vld [vmem:[#allocation5] sm:$0xff]  ;;  %vm105_vm1 = vcmask 7168  }
  0x36   :  { %v82_v2 = vmul.f32 %v73_v0, %v73_v0  ;;  %v86_v3 = vmul.f32 %v74_v1, %v74_v1  ;;  %v77_v4 = vmul.f32 %v74_v1, %v73_v0  ;;  %v76_v17 = vld [vmem:[#allocation7] sm:$0xff]  ;;  %s247_s2 = smov [#allocation8]  }
  0x37   :  { %s125_s19 = sshll.u32 %s247_s2, 4  ;;  %s126_s19 = int_to_ptr.vmem [resolvable:$true] %s125_s19 }
  0x38   :  { %v83_v5 = vsel %vm78_vm0, %v82_v2, 0.0  ;;  %v79_v6 = vsel %vm78_vm0, %v77_v4, 0.0  ;;  %v87_v7 = vsel %vm78_vm0, %v86_v3, 0.0  ;;  %s216_s21 = scalar_lea.vmem %s126_s19, 128  ;;  %p221_p11 = scmp.lt.s32.totalorder %s126_s19, %s126_s19 }
  0x39   :  { %84 = vadd.xlane.f32.xlu0 %v83_v5  ;;  %80 = vadd.xlane.f32.xlu1 %v79_v6  ;;  %p217_p10 = scmp.ne.s32.totalorder %s126_s19, %s216_s21  ;;  %p222_p12 = scmp.lt.s32.totalorder %s216_s21, %s216_s21 }
  0x3b   :  { %p223_p13 = por %p222_p12, %p221_p11 }
  0x3d   :  { %88 = vadd.xlane.f32.xlu0 %v87_v7  ;;  %p224_p0 = pnand %p223_p13, %p217_p10 }
  0xc6   :  { %v85_v8 = vpop.xlane.xlu0 %84  ;;  %v81_v13 = vpop.xlane.xlu1 %80 }
  0xc7   :  { %v90_v9 = vmax.f32 %v85_v8, 1e-16 }
  0xc9   :  { %146 = vrsqrt.f32 %v90_v9 }
  0xca   :  { %v89_v10 = vpop.xlane.xlu0 %88 }
  0xcb   :  { %v93_v11 = vmax.f32 %v89_v10, 1e-16 }
  0xcd   :  { %148 = vrsqrt.f32 %v93_v11 }
  0xd3   :  { %v147_v12 = vpop.eup %146 }
  0xd4   :  { %v92_v14 = vmul.f32 %v147_v12, %v81_v13 }
  0xd7   :  { %v149_v15 = vpop.eup %148 }
  0xd8   :  { %v95_v16 = vmul.f32 %v149_v15, %v92_v14 }
  0xda   :  { %v101_v18 = vsub.f32 0.0, %v95_v16 }
  0xdc   :  { %v102_v19 = vmul.f32 %v101_v18, %v76_v17 }
  0xde   :  { %v106_v20 = vsel %vm105_vm1, %v102_v19, 0.0 }
  0xdf   :  { %107 = vadd.xlane.f32.xlu1 %v106_v20 }
 0x16c   :  { %v108_v21 = vpop.xlane.xlu1 %107 }
 0x16d   :  { %v109_v22 = vrot.slane %v108_v21, 4 }
 0x16f   :  { %v110_v23 = vadd.f32 %v109_v22, %v108_v21 }
 0x171   :  { %v111_v24 = vrot.slane %v110_v23, 2 }
 0x173   :  { %v112_v25 = vadd.f32 %v111_v24, %v110_v23 }
 0x175   :  { %v113_v26 = vrot.slane %v112_v25, 1 }
 0x177   :  { %v114_v27 = vadd.f32 %v113_v26, %v112_v25 }
 0x179   :  { %139 = vpush %v114_v27 }
 0x1aa   :  { %s140_s20 = spop %139 }
 0x1ab   :  { %v116_v28 = vstv %s140_s20 }
 0x1ac   :  { %118 = vst [vmem:[#allocation8] sm:$0xff] %v116_v28 }
 0x1ad   :  { %227 = shalt.err (!%p224_p0)
}
 0x1ae   :  { %s228_s24 = scalar_lea.hbm %s319_s3, 128 }
 0x1af   :  { %p229_p1 = scmp.ne.s32.totalorder %s319_s3, %s228_s24  ;;  %p232_p2 = scmp.lt.u32.totalorder %s228_s24, %s319_s3 }
 0x1b1   :  { %p234_p3 = pnand %p232_p2, %p229_p1 }
 0x1b3   :  { %237 = shalt.err (!%p234_p3)
}
 0x1b4   :  { %128 = dma.vmem_to_hbm [thread:$0]  %s126_s19, 128, %s319_s3, [#allocation4]  }
 0x1b5   :  { %242 = dma.done.wait [#allocation4], 128  }
 0x1b6   :  { %243 = vsyncadd [#allocation4], 4294967168 }
 0x1b7   :  { %132 = vsyncpa [#allocation3], 1 }
 0x1b8   :  { %133 = vsyncpa [#allocation6], 1 }
 0x1b9   :  { %134 = vsyncpa [#allocation4], 1 }

</bundles_post_ra>
